<compile_context>
chip_gen: v7x
topology: tpu7x:2x2x1
jax: 0.10.0
libtpu: 0.0.40
codegen_flags: <defaults>
</compile_context>

<pallas_src>
import jax
import jax.numpy as jnp
from jax.experimental import pallas as pl
from jax.experimental.pallas import tpu as pltpu


# Native sublane packing per element size: f32 -> 8, bf16/f16 -> 16, int8/fp8 -> 32.
_SUBLANE_PACK = {4: 8, 2: 16, 1: 32}


def _chip_tiling():
    """Per-generation (tile_bytes_per_buffer, vmem_limit_bytes_or_None)."""
    kind = ""
    try:
        kind = jax.devices()[0].device_kind.lower()
    except Exception:
        pass
    if "v7" in kind or "7x" in kind:
        # v7x: ~3.2 TB/s HBM -> big tiles amortize the ~0.35us/step pipeline overhead.
        # 4 pipelined buffers x 8 MiB = 32 MiB exceeds the 32 MiB scoped default but is
        # well under the 64 MiB physical VMEM per TensorCore -> raise the limit.
        return 8 * 1024 * 1024, 48 * 1024 * 1024
    if "v6" in kind:
        # v6e: 4 MiB tiles (~86% of roofline); 16 MiB total stays under the 32 MiB default.
        return 4 * 1024 * 1024, None
    # v5e (and older/unknown chips): 2 MiB tiles keep 4 buffers under the 16 MiB scoped
    # default and already amortize per-step overhead at ~820 GB/s.
    return 2 * 1024 * 1024, None


def _make_clipped_relu_kernel(lo: float, hi: float):
    # lo/hi are static module parameters.  Cast to the tile dtype so bf16/fp16 tiles are
    # not promoted to f32.  (For integer / fp8 inputs the bounds would be rounded to the
    # input dtype — fine for representable float bounds like 0.0 / 1.0 / 6.0.)
    def kernel(x_ref, o_ref):
        x = x_ref[...]
        o_ref[...] = jnp.clip(x, jnp.asarray(lo, x.dtype), jnp.asarray(hi, x.dtype))
    return kernel


def _clipped_relu_2d(x2d: jnp.ndarray, lo: float, hi: float) -> jnp.ndarray:
    """Run the clip kernel on a lane-dense (rows, width) slab; width % 128 == 0."""
    rows, width = x2d.shape
    itemsize = jnp.dtype(x2d.dtype).itemsize
    pack = _SUBLANE_PACK.get(itemsize, 8)
    tile_bytes, vmem_limit = _chip_tiling()

    target_rows = max(pack, tile_bytes // (width * itemsize))
    if rows <= target_rows:
        block_rows = rows                                   # full dim -> always legal
    else:
        block_rows = max(pack, (target_rows // pack) * pack)  # keep sublane packing

    grid = (pl.cdiv(rows, block_rows),)                     # ragged last block handled by Pallas

    cp_kwargs = dict(dimension_semantics=("parallel",))
    # TODO(synk): on v7x, confirm via xprof that the "parallel" axis really shards across
    # both TensorCores; if not, switch to a leading 2-way axis with pltpu.CORE_PARALLEL.
    if vmem_limit is not None:
        cp_kwargs["vmem_limit_bytes"] = vmem_limit

    nbytes = rows * width * itemsize
    return pl.pallas_call(
        _make_clipped_relu_kernel(lo, hi),
        out_shape=jax.ShapeDtypeStruct((rows, width), x2d.dtype),
        grid_spec=pltpu.PrefetchScalarGridSpec(
            num_scalar_prefetch=0,
            grid=grid,
            in_specs=[pl.BlockSpec((block_rows, width), lambda i: (i, 0))],
            out_specs=pl.BlockSpec((block_rows, width), lambda i: (i, 0)),
        ),
        compiler_params=pltpu.CompilerParams(**cp_kwargs),
        input_output_aliases={0: 0},
        cost_estimate=pl.CostEstimate(
            flops=2 * rows * width, transcendentals=0, bytes_accessed=2 * nbytes),
    )(x2d)


def clipped_relu(x: jnp.ndarray, min_val: float = 0.0, max_val: float = 1.0) -> jnp.ndarray:
    """Elementwise clamp(relu(x), min_val, max_val) via a Pallas TPU kernel."""
    orig_shape = x.shape
    n = x.size
    if n == 0:
        return x

    # clamp(relu(x), lo, hi) == clip(x, max(lo, 0), hi); the max bound is applied last,
    # so min_val > max_val collapses to max_val, exactly like torch.clamp.
    lo = max(float(min_val), 0.0)
    hi = float(max_val)

    x_flat = x.reshape(-1)

    # Fast path: widest lane-dense width that divides n -> zero-copy reshape, no tail.
    width = next((w for w in (1024, 512, 256, 128) if n % w == 0), None)
    if width is not None:
        out2d = _clipped_relu_2d(x_flat.reshape(n // width, width), lo, hi)
        return out2d.reshape(orig_shape)

    # Ragged path: run the kernel on the 128-aligned bulk, clip the <128-element tail
    # with a tiny fused jnp op, and stitch the pieces together (no full-tensor pad/slice).
    tail = n % 128
    bulk = n - tail
    pieces = []
    if bulk:
        bwidth = next(w for w in (1024, 512, 256, 128) if bulk % w == 0)
        bulk_out = _clipped_relu_2d(x_flat[:bulk].reshape(bulk // bwidth, bwidth), lo, hi)
        pieces.append(bulk_out.reshape(-1))
    tail_out = jnp.clip(x_flat[bulk:], jnp.asarray(lo, x.dtype), jnp.asarray(hi, x.dtype))
    pieces.append(tail_out)
    out_flat = pieces[0] if len(pieces) == 1 else jnp.concatenate(pieces)
    return out_flat.reshape(orig_shape)


def _torch_ref(x, min_val, max_val):
    # torch.clamp(F.relu(x), min, max): min applied first, max applied last.
    return jnp.minimum(
        jnp.maximum(jnp.maximum(x, jnp.asarray(0.0, x.dtype)),
                    jnp.asarray(min_val, x.dtype)),
        jnp.asarray(max_val, x.dtype))


if __name__ == "__main__":
    key = jax.random.PRNGKey(0)
    k0, k1, k2, k3 = jax.random.split(key, 4)

    # 1) NCHW input consistent with the module: batch=2, channels=4, 16x16 spatial.
    x = jax.random.normal(k0, (2, 4, 16, 16), dtype=jnp.float32) * 2.0
    y_ref = _torch_ref(x, 0.0, 1.0)
    y = jax.block_until_ready(clipped_relu(x, 0.0, 1.0))
    assert y.shape == x.shape and y.dtype == x.dtype
    assert jnp.allclose(y, y_ref, atol=1e-6), "mismatch vs reference (aligned path)"

    # 2) Ragged path (size not a multiple of 128): bulk kernel + tiny tail clip.
    x2 = jax.random.normal(k1, (3, 5, 7, 11), dtype=jnp.float32) * 3.0
    y2_ref = _torch_ref(x2, 0.0, 1.0)
    y2 = jax.block_until_ready(clipped_relu(x2, 0.0, 1.0))
    assert y2.shape == x2.shape and y2.dtype == x2.dtype
    assert jnp.allclose(y2, y2_ref, atol=1e-6), "mismatch vs reference (ragged path)"

    # 3) min_val > max_val edge case (torch.clamp returns max_val everywhere).
    x3 = jax.random.normal(k2, (2, 64), dtype=jnp.float32) * 2.0
    y3_ref = _torch_ref(x3, 0.7, 0.3)
    y3 = jax.block_until_ready(clipped_relu(x3, 0.7, 0.3))
    assert jnp.allclose(y3, y3_ref, atol=1e-6), "mismatch vs reference (min>max edge)"

    # 4) bf16 tile with non-default bounds (ReLU6-style), exercises sublane packing = 16.
    x4 = (jax.random.normal(k3, (2, 4, 128), dtype=jnp.float32) * 4.0).astype(jnp.bfloat16)
    y4_ref = _torch_ref(x4, 0.0, 6.0)
    y4 = jax.block_until_ready(clipped_relu(x4, 0.0, 6.0))
    assert y4.dtype == jnp.bfloat16
    assert jnp.allclose(y4.astype(jnp.float32), y4_ref.astype(jnp.float32), atol=1e-6), \
        "mismatch vs reference (bf16 path)"

    print("KERNEL_OK")
</pallas_src>

<mosaic_0001>
module attributes {stable_mosaic.version = 11 : i64} {
  func.func @kernel(%arg0: i32, %arg1: memref<2x1024xf32, #tpu.memory_space<vmem>>, %arg2: memref<2x1024xf32, #tpu.memory_space<vmem>>) attributes {dimension_semantics = [#tpu.dimension_semantics<parallel>], iteration_bounds = array<i64: 1>, scalar_prefetch = 0 : i64, scratch_operands = 0 : i64, tpu.core_type = #tpu.core_type<tc>, window_params = [{transform_indices = @transform_0, window_bounds = array<i64: 2, 1024>}, {transform_indices = @transform_1, window_bounds = array<i64: 2, 1024>}]} {
    %c0 = arith.constant 0 : index
    %c0_0 = arith.constant 0 : index
    %0 = vector.load %arg1[%c0, %c0_0] : memref<2x1024xf32, #tpu.memory_space<vmem>>, vector<2x1024xf32>
    %cst = arith.constant 0.000000e+00 : f32
    %cst_1 = arith.constant 1.000000e+00 : f32
    %1 = vector.broadcast %cst : f32 to vector<2x1024xf32>
    %2 = arith.maximumf %1, %0 : vector<2x1024xf32>
    %3 = vector.broadcast %cst_1 : f32 to vector<2x1024xf32>
    %4 = arith.minimumf %3, %2 : vector<2x1024xf32>
    %c0_2 = arith.constant 0 : index
    %c0_3 = arith.constant 0 : index
    %5 = vector.load %arg2[%c0_2, %c0_3] : memref<2x1024xf32, #tpu.memory_space<vmem>>, vector<2x1024xf32>
    tpu.vector_store %arg2[%c0_2, %c0_3], %4 {strides = array<i32>} : memref<2x1024xf32, #tpu.memory_space<vmem>>, vector<2x1024xf32>,
    return
  }
  func.func @transform_0(%arg0: i32) -> (i32, i32) {
    %c0_i32 = arith.constant 0 : i32
    %c0_i32_0 = arith.constant 0 : i32
    return %arg0, %c0_i32 : i32, i32
  }
  func.func @transform_1(%arg0: i32) -> (i32, i32) {
    %c0_i32 = arith.constant 0 : i32
    %c0_i32_0 = arith.constant 0 : i32
    return %arg0, %c0_i32 : i32, i32
  }
}

</mosaic_0001>

<bundles_post_ra>
// kernel: tpu_custom_call.1
= control target key start
LH: loop header
LB: loop body
LE: loop exit
PB: predicated region body
PF: predicated region fallthrough
CT: control target
= control target key end

     0   :  { %6 = vsyncpa [#allocation3], 0  ;;  %s130_s0 = inlined_call_operand.hbm [shape: f32[2,1024], index: 0, kind: input, shape index: {}, may-alias: {0,1}]   ;;  %s131_s1 = inlined_call_operand.hbm [shape: f32[2,1024], index: 1, kind: output, shape index: {}, may-alias: {0,1}]  }
   0x1   :  { %7 = vsyncpa [#allocation4], 0  ;;  %s94_s6 = smov [#allocation2]   ;;  %s46_s10 = scalar_lea.hbm %s130_s0, 256 }
   0x2   :  { %s14_s7 = sshll.u32 %s94_s6, 4  ;;  %p47_p0 = scmp.ne.s32.totalorder %s130_s0, %s46_s10  ;;  %s15_s7 = int_to_ptr.vmem [resolvable:$true] %s14_s7 }
   0x3   :  { %p50_p1 = scmp.lt.u32.totalorder %s46_s10, %s130_s0 }
   0x5   :  { %p52_p2 = pnand %p50_p1, %p47_p0 }
   0x7   :  { %55 = shalt.err (!%p52_p2)
}
   0x8   :  { %s56_s15 = scalar_lea.vmem %s15_s7, 256  ;;  %p61_p4 = scmp.lt.s32.totalorder %s15_s7, %s15_s7 }
   0x9   :  { %p57_p3 = scmp.ne.s32.totalorder %s15_s7, %s56_s15  ;;  %p62_p5 = scmp.lt.s32.totalorder %s56_s15, %s56_s15 }
   0xb   :  { %p63_p6 = por %p62_p5, %p61_p4 }
   0xd   :  { %p64_p7 = pnand %p63_p6, %p57_p3 }
   0xf   :  { %67 = shalt.err (!%p64_p7)
}
  0x10   :  { %17 = dma.hbm_to_vmem [thread:$0]  %s130_s0, 256, %s15_s7, [#allocation3]  }
  0x11   :  { %90 = dma.done.wait [#allocation3], 256  }
  0x12   :  { %91 = vsyncadd [#allocation3], 4294967040  ;;  %v21_v0 = vld [vmem:[#allocation2] sm:$0xff]  ;;  %v22_v1 = vld [vmem:[#allocation2 + $0x8] sm:$0xff]  ;;  %s95_s18 = smov [#allocation5]  }
  0x13   :  { %s35_s19 = sshll.u32 %s95_s18, 4  ;;  %v23_v2 = vmax.f32 %v21_v0, 0.0  ;;  %v24_v3 = vmax.f32 %v22_v1, 0.0  ;;  %s36_s19 = int_to_ptr.vmem [resolvable:$true] %s35_s19 }
  0x14   :  { %s68_s20 = scalar_lea.vmem %s36_s19, 256  ;;  %p73_p9 = scmp.lt.s32.totalorder %s36_s19, %s36_s19 }
  0x15   :  { %v25_v4 = vmin.f32 %v23_v2, 1.0  ;;  %v26_v5 = vmin.f32 %v24_v3, 1.0  ;;  %p69_p8 = scmp.ne.s32.totalorder %s36_s19, %s68_s20  ;;  %p74_p10 = scmp.lt.s32.totalorder %s68_s20, %s68_s20 }
  0x17   :  { %27 = vst [vmem:[#allocation5] sm:$0xff] %v25_v4  ;;  %28 = vst [vmem:[#allocation5 + $0x8] sm:$0xff] %v26_v5  ;;  %p75_p11 = por %p74_p10, %p73_p9 }
  0x19   :  { %p76_p12 = pnand %p75_p11, %p69_p8 }
  0x1b   :  { %79 = shalt.err (!%p76_p12)
}
  0x1c   :  { %s80_s22 = scalar_lea.hbm %s131_s1, 256 }
  0x1d   :  { %p81_p13 = scmp.ne.s32.totalorder %s131_s1, %s80_s22  ;;  %p84_p0 = scmp.lt.u32.totalorder %s80_s22, %s131_s1 }
  0x1f   :  { %p86_p1 = pnand %p84_p0, %p81_p13 }
  0x21   :  { %89 = shalt.err (!%p86_p1)
}
  0x22   :  { %38 = dma.vmem_to_hbm [thread:$0]  %s36_s19, 256, %s131_s1, [#allocation4]  }
  0x23   :  { %92 = dma.done.wait [#allocation4], 256  }
  0x24   :  { %93 = vsyncadd [#allocation4], 4294967040 }
  0x25   :  { %42 = vsyncpa [#allocation3], 1 }
  0x26   :  { %43 = vsyncpa [#allocation4], 1 }

</bundles_post_ra>
